<compile_context>
chip_gen: v5e
topology: v5e:2x2
jax: 0.10.0
libtpu: 0.0.40
codegen_flags: <defaults>
</compile_context>

<pallas_src>
import functools

import jax
import jax.numpy as jnp
import numpy as np
from jax.experimental import pallas as pl
from jax.experimental.pallas import tpu as pltpu


def _cdiv(a, b):
    return (a + b - 1) // b


def _round_up(x, m):
    return _cdiv(x, m) * m


# ---------------------------------------------------------------------------
# Hardware-aware budgets
# ---------------------------------------------------------------------------
@functools.lru_cache(maxsize=1)
def _tpu_budget():
    """Returns (num_tensorcores, vmem_limit_bytes, tm_max)."""
    try:
        vmem_cap = int(pltpu.get_tpu_info().vmem_capacity_bytes)
    except Exception:
        # Unknown backend (e.g. interpret mode): assume the smallest (v7x-like)
        # VMEM so budgets stay safe everywhere.
        vmem_cap = 64 * 1024 * 1024
    if vmem_cap >= 128 * 1024 * 1024:
        # v5e / v6e: 128 MiB VMEM, 1 TensorCore per chip -> big tiles, no split.
        return 1, 64 * 1024 * 1024, 2048
    # v7x-like: 64 MiB VMEM per TC, 2 TensorCores per chip -> smaller caps.
    return 2, 48 * 1024 * 1024, 1024


def _padded_tile_bytes(rows, cols, dtype):
    """Mosaic VMEM footprint of one [rows, cols] tile (sublane/lane padded)."""
    itemsize = jnp.dtype(dtype).itemsize
    sublane = (8 * 4) // itemsize          # 8 for f32, 16 for bf16
    return _round_up(rows, sublane) * _round_up(cols, 128) * itemsize


# ---------------------------------------------------------------------------
# Pallas MXU matmul kernels
# ---------------------------------------------------------------------------
def _matmul_kernel_fullk(a_ref, b_ref, o_ref):
    # Single K step: no accumulator scratch, no init/finalize predication,
    # one store per output tile.
    o_ref[...] = jnp.dot(a_ref[...], b_ref[...],
                         preferred_element_type=jnp.float32)


def _matmul_kernel_ktiled(a_ref, b_ref, o_ref, acc_ref):
    # General path for very large K (not used at the default shapes).
    @pl.when(pl.program_id(2) == 0)
    def _():
        acc_ref[...] = jnp.zeros_like(acc_ref)

    acc_ref[...] += jnp.dot(a_ref[...], b_ref[...],
                            preferred_element_type=jnp.float32)

    @pl.when(pl.program_id(2) == pl.num_programs(2) - 1)
    def _():
        o_ref[...] = acc_ref[...]


def pallas_matmul(a, b):
    """a: [M, K], b: [K, N] (same dtype, typically bf16).

    Returns exactly [M, N] float32 computed on the MXU with f32 accumulation.
    No caller-side M/N padding or post-slicing is required: the output tile's
    last dim carries the full N (near-lane-dense stores) and partial M blocks
    are handled by Pallas.
    """
    M, K = a.shape
    K2, N = b.shape
    assert K == K2
    num_tc, vmem_limit, tm_max = _tpu_budget()
    budget = vmem_limit - 8 * 1024 * 1024     # headroom for Mosaic internals

    # --- N handling: exact N when it fits one tile column (default N = 125),
    # otherwise 128-pad + tile + slice back (not hit at this module's shapes).
    if N <= 2048:
        tn, Np, pad_n = N, N, False
    else:
        Np = _round_up(N, 128)
        tn, pad_n = min(512, Np), True
        b = jnp.pad(b, ((0, 0), (0, Np - N)))

    # --- M tile: full extent if it fits, else 16-aligned tiles (ragged last
    # block handled by Pallas -> no M padding, no trailing slice).
    tm = M if M <= tm_max else tm_max

    # v7x only (2 TensorCores/chip): if the grid would otherwise be a single
    # tile, split M so both cores get work.  Gated on the hardware query so
    # single-TC v5e/v6e never pay the extra grid step.
    if num_tc == 2 and M >= 256 and _cdiv(M, tm) == 1 and _cdiv(Np, tn) == 1:
        tm = _round_up(_cdiv(M, 2), 16)

    def working_set(tm_, tn_):
        # Double-buffered, *layout-padded* footprints.
        return (2 * _padded_tile_bytes(tm_, K, a.dtype)
                + 2 * _padded_tile_bytes(K, tn_, b.dtype)
                + 2 * _padded_tile_bytes(tm_, tn_, jnp.float32))

    for _ in range(16):
        if working_set(tm, tn) <= budget:
            break
        new_tm = max(16, _round_up(tm // 2, 16))
        if new_tm < tm and new_tm <= M:
            tm = new_tm
        elif pad_n and tn > 128:
            tn = max(128, _round_up(tn // 2, 128))
        else:
            break

    cost = pl.CostEstimate(
        flops=2 * M * K * N,
        transcendentals=0,
        bytes_accessed=(M * K * a.dtype.itemsize
                        + K * Np * b.dtype.itemsize
                        + M * Np * 4))

    if working_set(tm, tn) <= budget:
        # Fast path (always taken at this module's shapes; K = Cin*kh*kw*T1 is
        # tiny): full K per step -> no k grid axis, no accumulator scratch.
        grid = (_cdiv(M, tm), _cdiv(Np, tn))
        out = pl.pallas_call(
            _matmul_kernel_fullk,
            out_shape=jax.ShapeDtypeStruct((M, Np), jnp.float32),
            grid_spec=pltpu.PrefetchScalarGridSpec(
                num_scalar_prefetch=0,
                grid=grid,
                in_specs=[pl.BlockSpec((tm, K), lambda i, j: (i, 0)),
                          pl.BlockSpec((K, tn), lambda i, j: (0, j))],
                out_specs=pl.BlockSpec((tm, tn), lambda i, j: (i, j))),
            compiler_params=pltpu.CompilerParams(
                dimension_semantics=("parallel", "parallel"),
                vmem_limit_bytes=vmem_limit),
            cost_estimate=cost,
        )(a, b)
        return out if not pad_n else out[:, :N]

    # General fallback (huge K only): tile K and accumulate in f32 VMEM scratch.
    tk = 512
    Kp = _round_up(K, tk)
    if not pad_n:
        Np = _round_up(N, 128)
        tn, pad_n = min(512, Np), True
        b = jnp.pad(b, ((0, 0), (0, Np - N)))
    a_p = jnp.pad(a, ((0, 0), (0, Kp - K)))
    b_p = jnp.pad(b, ((0, Kp - K), (0, 0)))
    tm = min(tm, 512)
    grid = (_cdiv(M, tm), _cdiv(Np, tn), Kp // tk)
    out = pl.pallas_call(
        _matmul_kernel_ktiled,
        out_shape=jax.ShapeDtypeStruct((M, Np), jnp.float32),
        grid_spec=pltpu.PrefetchScalarGridSpec(
            num_scalar_prefetch=0,
            grid=grid,
            in_specs=[pl.BlockSpec((tm, tk), lambda i, j, k: (i, k)),
                      pl.BlockSpec((tk, tn), lambda i, j, k: (k, j))],
            out_specs=pl.BlockSpec((tm, tn), lambda i, j, k: (i, j)),
            scratch_shapes=[pltpu.VMEM((tm, tn), jnp.float32)]),
        compiler_params=pltpu.CompilerParams(
            dimension_semantics=("parallel", "parallel", "arbitrary"),
            vmem_limit_bytes=vmem_limit),
        cost_estimate=cost,
    )(a_p, b_p)
    return out[:, :N]


# ---------------------------------------------------------------------------
# Forward implementation (jitted so the A-matrix build fuses into one pass)
# ---------------------------------------------------------------------------
def _forward_impl(x, w_mat, *, kh, kw, pad_h, pad_w, sh, sw,
                  cout, o_dims, compute_dtype):
    B, Cin, H, W, T0, T1 = x.shape
    K = Cin * kh * kw * T1

    oh = (H + 2 * pad_h - kh) // sh + 1
    ow = (W + 2 * pad_w - kw) // sw + 1
    assert oh > 0 and ow > 0

    # cal_offset's border window/weight truncation == zero-padding + full
    # windows.
    # TODO(synk): PyTorch's cal_offset uses kh in its w<0 branch (a typo); we
    # implement the intended symmetric semantics (identical when kh == kw or
    # padding == 0).
    # For the default Cin == T1 == 1 this transpose only moves size-1 axes
    # (pure metadata); for general configs it fuses under jit with the pad,
    # window slices, concat and bf16 cast into the single XLA fusion that
    # writes the A matrix.
    xt = x.transpose(0, 2, 3, 4, 1, 5).reshape(B, H, W, T0, Cin * T1)
    if pad_h or pad_w:
        xt = jnp.pad(xt, ((0, 0), (pad_h, pad_h), (pad_w, pad_w),
                          (0, 0), (0, 0)))

    # Slim im2col: strided window slices concatenated along the (lane) K axis
    # in (kh, kw, Cin, T1) order -- matches w_mat's precomputed row order.
    # TODO(synk): for very large H*W, fold this im2col into the Pallas kernel
    # (xt via memory_space=pl.ANY + per-(dh,dw) strided make_async_copy into a
    # [tm, K] VMEM scratch) to drop the A-matrix HBM round trip; with K = 9 it
    # is a small fraction of the dominant N*4-bytes-per-row output stream.
    cols = []
    for dh in range(kh):
        for dw in range(kw):
            cols.append(xt[:, dh:dh + sh * (oh - 1) + 1:sh,
                           dw:dw + sw * (ow - 1) + 1:sw, :, :])
    a_mat = jnp.concatenate(cols, axis=-1)                 # [B, oh, ow, T0, K]
    M = B * oh * ow * T0
    a_mat = a_mat.reshape(M, K).astype(compute_dtype)

    out = pallas_matmul(a_mat, w_mat)                      # exactly [M, N] f32
    # No post-kernel [:M, :N] slice pass.  The reshape is metadata; with the
    # default cout == 1 the transpose only moves a size-1 axis and is free too,
    # so there is no second pass over the (largest) output tensor.
    out = out.reshape(B, oh, ow, T0, cout, *o_dims)
    return out.transpose(0, 4, 1, 2, 3, 5, 6, 7)           # [B,Cout,oh,ow,T0,O1,O2,O3]


# ---------------------------------------------------------------------------
# TensorConvLayerInput (JAX / Pallas)
# ---------------------------------------------------------------------------
class TensorConvLayerInputPallas:
    """Tensor-based convolution layer (output_tensor of length 4, not compressed)."""

    def __init__(self, key, kh=3, kw=3, pad_h=0, pad_w=0, stride_h=2, stride_w=2,
                 in_channel=1, out_channel=1, input_tensor=(3, 1),
                 output_tensor=(5, 5, 5, 5), compute_dtype=jnp.bfloat16):
        assert pad_h < kh and pad_w < kw
        assert len(output_tensor) == 4
        self.kh, self.kw = kh, kw
        self.pad_h, self.pad_w = pad_h, pad_w
        self.stride_h, self.stride_w = stride_h, stride_w
        self.in_channel, self.out_channel = in_channel, out_channel
        self.input_tensor = tuple(input_tensor)
        self.output_tensor = tuple(output_tensor)
        self.compute_dtype = compute_dtype

        T1 = input_tensor[1]
        O1, O2, O3 = output_tensor[1], output_tensor[2], output_tensor[3]
        wshape = (out_channel, in_channel, kh, kw, T1, O1, O2, O3)
        # kaiming_normal_(a=0, mode='fan_out'): std = sqrt(2 / fan_out),
        # fan_out = shape[0] * prod(shape[2:])  (deterministic init, not a ckpt)
        fan_out = out_channel * int(np.prod(wshape[2:]))
        std = float(np.sqrt(2.0 / fan_out))
        self.weights = std * jax.random.normal(key, wshape, dtype=jnp.float32)

        # --- static weight-matrix precompute (once, off the forward path) ---
        # K rows ordered (kh, kw, Cin, T1); N kept EXACT (the kernel's output
        # block carries the full N, so no lane padding and no post-kernel
        # slice); bf16 operands, f32 MXU accumulation.  (Switching
        # compute_dtype to jnp.float32 is nearly free here -- K is tiny and
        # the workload is output-stream bound -- if bit-closer parity with the
        # f32 PyTorch module is needed.)
        self.K = in_channel * kh * kw * T1
        self.N = out_channel * O1 * O2 * O3
        w_mat = self.weights.transpose(2, 3, 1, 4, 0, 5, 6, 7).reshape(self.K, self.N)
        self.w_mat = w_mat.astype(compute_dtype)

        self._forward = jax.jit(functools.partial(
            _forward_impl, kh=kh, kw=kw, pad_h=pad_h, pad_w=pad_w,
            sh=stride_h, sw=stride_w, cout=out_channel,
            o_dims=(O1, O2, O3), compute_dtype=compute_dtype))

    def __call__(self, x):
        # x: [B, C_in, H, W, T0, T1]
        B, Cin, H, W, T0, T1 = x.shape
        assert Cin == self.in_channel
        assert (T0, T1) == self.input_tensor
        return self._forward(x, self.w_mat)


# ---------------------------------------------------------------------------
# Reference (pure-JAX mirror of the PyTorch forward, pad=0 path)
# ---------------------------------------------------------------------------
def reference_forward(x, weights, kh, kw, sh, sw):
    B, Cin, H, W, T0, T1 = x.shape
    Cout = weights.shape[0]
    O1, O2, O3 = weights.shape[5], weights.shape[6], weights.shape[7]
    oh = (H - kh) // sh + 1
    ow = (W - kw) // sw + 1
    out = jnp.zeros((B, Cout, oh, ow, T0, O1, O2, O3), dtype=jnp.float32)
    for i in range(oh):
        for j in range(ow):
            win = x[:, :, i * sh:i * sh + kh, j * sw:j * sw + kw, :, :]
            val = jnp.einsum('abcdef,gbcdfhij->agehij', win, weights)
            out = out.at[:, :, i, j].set(val)
    return out


if __name__ == "__main__":
    key = jax.random.PRNGKey(0)
    k_w, k_x = jax.random.split(key)

    # Small shapes consistent with the module defaults:
    # batch=2, in_channel=1, H=W=8, input_tensor=[3,1], output_tensor=[5,5,5,5]
    B, Cin, H, W = 2, 1, 8, 8
    T0, T1 = 3, 1
    layer = TensorConvLayerInputPallas(
        k_w, kh=3, kw=3, pad_h=0, pad_w=0, stride_h=2, stride_w=2,
        in_channel=Cin, out_channel=1, input_tensor=(T0, T1),
        output_tensor=(5, 5, 5, 5))

    x = jax.random.normal(k_x, (B, Cin, H, W, T0, T1), dtype=jnp.float32)

    out = layer(x)
    out = jax.block_until_ready(out)

    ref = reference_forward(x, layer.weights, layer.kh, layer.kw,
                            layer.stride_h, layer.stride_w)
    assert out.shape == ref.shape, (out.shape, ref.shape)
    # bf16 operands (f32 accumulation) -> small, expected numeric drift vs the
    # f32 reference; tolerance loosened accordingly.
    np.testing.assert_allclose(np.asarray(out), np.asarray(ref),
                               rtol=3e-2, atol=3e-2)
    print("KERNEL_OK")
</pallas_src>

<mosaic_0001>
module attributes {stable_mosaic.version = 11 : i64} {
  func.func @_matmul_kernel_fullk(%arg0: i32, %arg1: i32, %arg2: memref<54x9xbf16, #tpu.memory_space<vmem>>, %arg3: memref<9x125xbf16, #tpu.memory_space<vmem>>, %arg4: memref<54x125xf32, #tpu.memory_space<vmem>>) attributes {dimension_semantics = [#tpu.dimension_semantics<parallel>, #tpu.dimension_semantics<parallel>], iteration_bounds = array<i64: 1, 1>, scalar_prefetch = 0 : i64, scratch_operands = 0 : i64, tpu.core_type = #tpu.core_type<tc>, window_params = [{transform_indices = @transform_0, window_bounds = array<i64: 54, 9>}, {transform_indices = @transform_1, window_bounds = array<i64: 9, 125>}, {transform_indices = @transform_2, window_bounds = array<i64: 54, 125>}]} {
    %c0 = arith.constant 0 : index
    %c0_0 = arith.constant 0 : index
    %0 = vector.load %arg2[%c0, %c0_0] : memref<54x9xbf16, #tpu.memory_space<vmem>>, vector<54x9xbf16>
    %c0_1 = arith.constant 0 : index
    %c0_2 = arith.constant 0 : index
    %1 = vector.load %arg3[%c0_1, %c0_2] : memref<9x125xbf16, #tpu.memory_space<vmem>>, vector<9x125xbf16>
    %cst = arith.constant dense<0.000000e+00> : vector<54x125xf32>
    %2 = tpu.matmul %0, %1, %cst {dimension_numbers = #tpu.dot_dimension_numbers<[1], [0], [0], [1], [0, 0, 1, 1], [], []>} : vector<54x9xbf16>, vector<9x125xbf16>, vector<54x125xf32> -> vector<54x125xf32>
    %c0_3 = arith.constant 0 : index
    %c0_4 = arith.constant 0 : index
    %3 = vector.load %arg4[%c0_3, %c0_4] : memref<54x125xf32, #tpu.memory_space<vmem>>, vector<54x125xf32>
    tpu.vector_store %arg4[%c0_3, %c0_4], %2 {strides = array<i32>} : memref<54x125xf32, #tpu.memory_space<vmem>>, vector<54x125xf32>,
    return
  }
  func.func @transform_0(%arg0: i32, %arg1: i32) -> (i32, i32) {
    %c0_i32 = arith.constant 0 : i32
    %c0_i32_0 = arith.constant 0 : i32
    return %arg0, %c0_i32 : i32, i32
  }
  func.func @transform_1(%arg0: i32, %arg1: i32) -> (i32, i32) {
    %c0_i32 = arith.constant 0 : i32
    %c0_i32_0 = arith.constant 0 : i32
    return %c0_i32, %arg1 : i32, i32
  }
  func.func @transform_2(%arg0: i32, %arg1: i32) -> (i32, i32) {
    %c0_i32 = arith.constant 0 : i32
    return %arg0, %arg1 : i32, i32
  }
}

</mosaic_0001>

<bundles_post_ra>
// kernel: _forward_impl.1
= control target key start
LH: loop header
LB: loop body
LE: loop exit
PB: predicated region body
PF: predicated region fallthrough
CT: control target
= control target key end

     0   :  { %vm57_vm0 = vcmask 1043456   ;;  %vm58_vm1 = vcmask 1044480   ;;  %v133_v2 = vmov 65535   ;;  %vm44_vm2 = vcmask 72704   ;;  %s194_s1 = inlined_call_operand.vmem [shape: bf16[9,125], index: 1, kind: input, shape index: {}]   ;;  %s195_s0 = inlined_call_operand.vmem [shape: bf16[54,9], index: 0, kind: input, shape index: {}]   ;;  %s196_s2 = inlined_call_operand.vmem [shape: f32[54,125], index: 2, kind: output, shape index: {}]  }
   0x1   :  { %v119_v0 = vld [vmem:[%s194_s1] sm:$0xf]  ;;  %v128_v1 = vld [vmem:[%s194_s1] sm:$0x10]  ;;  %v59_v3 = vsel %vm57_vm0, 4294967295, %v133_v2  ;;  %v126_v10 = vld [vmem:[%s195_s0 + $0x8] sm:$0xff] }
   0x2   :  { %v120_v4 = vor.u32 %v128_v1, %v119_v0  ;;  %v60_v5 = vsel %vm58_vm1, %v59_v3, 0  ;;  %v18_v6 = vld [vmem:[%s195_s0 + $0x18] sm:$0x7]  ;;  %v125_v9 = vld [vmem:[%s195_s0] sm:$0xff]  ;;  %v127_v11 = vld [vmem:[%s195_s0 + $0x10] sm:$0xff]  ;;  %vm92_vm3 = vcmask 1022976  }
   0x3   :  { %v34_v7 = vunpack.c.l.b16 %v18_v6  ;;  %vm99_vm4 = vcmask 1020928  }
   0x4   :  { %v62_v8 = vand.u32 %v120_v4, %v60_v5 }
   0x5   :  { %v38_v12 = vpack.c.b16 %v34_v7, %v34_v7 }
   0x6   :  { %71 = vmatpush.bf16.msra.mxu0 %v62_v8  ;;  %129 = vmatpush.bf16.msra.mxu1 %v62_v8 }
   0x7   :  { %130 = vmatpush.bf16.msra.mxu2 %v62_v8  ;;  %131 = vmatpush.bf16.msra.mxu3 %v62_v8 }
   0x9   :  { %121 = vmatmul.msk.bf16.vlgmr.msra.gmra.mxu0 %vm44_vm2, %v125_v9  ;;  %122 = vmatmul.msk.bf16.vlgmr.msra.gmra.mxu1 %vm44_vm2, %v126_v10 }
   0xa   :  { %123 = vmatmul.msk.bf16.vlgmr.msra.gmra.mxu2 %vm44_vm2, %v127_v11  ;;  %124 = vmatmul.msk.bf16.vlgmr.msra.gmra.mxu3 %vm44_vm2, %v38_v12 }
  0x86   :  { %v73_v13 = vpop.f32.mrf.mxu0  ;;  %v78_v14 = vpop.f32.mrf.mxu1 }
  0x87   :  { %93 = vst.msk [vmem:[%s196_s2] sm:$0xff] %vm92_vm3, %v73_v13 }
  0x88   :  { %95 = vst.msk [vmem:[%s196_s2 + $0x10] sm:$0xff] %vm92_vm3, %v78_v14 }
  0x8d   :  { %v83_v15 = vpop.f32.mrf.mxu2  ;;  %v88_v16 = vpop.f32.mrf.mxu3 }
  0x8e   :  { %97 = vst.msk [vmem:[%s196_s2 + $0x20] sm:$0xff] %vm92_vm3, %v83_v15  ;;  %v75_v17 = vpop.f32.mrf.mxu0  ;;  %v80_v18 = vpop.f32.mrf.mxu1 }
  0x8f   :  { %100 = vst.msk [vmem:[%s196_s2 + $0x30] sm:$0x3f] %vm99_vm4, %v88_v16 }
  0x90   :  { %94 = vst.msk [vmem:[%s196_s2 + $0x8] sm:$0xff] %vm92_vm3, %v75_v17 }
  0x91   :  { %96 = vst.msk [vmem:[%s196_s2 + $0x18] sm:$0xff] %vm92_vm3, %v80_v18 }
  0x95   :  { %v85_v19 = vpop.f32.mrf.mxu2  ;;  %v90_v20 = vpop.f32.mrf.mxu3 }
  0x96   :  { %98 = vst.msk [vmem:[%s196_s2 + $0x28] sm:$0xff] %vm92_vm3, %v85_v19 }

</bundles_post_ra>
